<compile_context>
chip_gen: v7x
topology: tpu7x:2x2x1
jax: 0.10.0
libtpu: 0.0.40
codegen_flags: <defaults>
</compile_context>

<pallas_src>
import functools
import math

import jax
import jax.numpy as jnp
from jax import lax
from jax.experimental import pallas as pl
from jax.experimental.pallas import tpu as pltpu


def _make_pe_table(max_len: int, d_model: int) -> jnp.ndarray:
    """Deterministic sin/cos positional table, identical to the PyTorch init."""
    position = jnp.arange(max_len, dtype=jnp.float32)[:, None]            # [L, 1]
    div_term = jnp.exp(
        jnp.arange(0, d_model, 2, dtype=jnp.float32) * (-math.log(10000.0) / d_model)
    )                                                                     # [D/2]
    pe = jnp.zeros((max_len, d_model), dtype=jnp.float32)
    pe = pe.at[:, 0::2].set(jnp.sin(position * div_term))
    pe = pe.at[:, 1::2].set(jnp.cos(position * div_term))
    return pe                                                             # [L, D]


def _hash_uniform_bits(seed_u32, offset_u32, row_stride: int, n_rows: int, n_cols: int):
    """Fallback stateless uint32 bits for an (n_rows, n_cols) strip.

    Two fmix-style rounds over (global flat index ^ seed); an odd constant is
    added before mixing so idx == seed has no zero fixed point.
    NOTE: flat indices wrap mod 2^32, so masks alias for > 4G-element inputs.
    """
    rows = lax.broadcasted_iota(jnp.int32, (n_rows, n_cols), 0).astype(jnp.uint32)
    cols = lax.broadcasted_iota(jnp.int32, (n_rows, n_cols), 1).astype(jnp.uint32)
    idx = offset_u32 + rows * jnp.uint32(row_stride) + cols
    h = (idx ^ seed_u32) + jnp.uint32(0x9E3779B9)
    h = h * jnp.uint32(0x85EBCA6B)
    h = h ^ (h >> jnp.uint32(16))
    h = h * jnp.uint32(0xC2B2AE35)
    h = h ^ (h >> jnp.uint32(16))
    return h


def _pe_dropout_kernel(seed_ref, x_ref, pe_ref, o_ref, *, p: float, training: bool,
                       batch: int, d_model: int, use_hw_prng: bool):
    # x_ref / o_ref: [tile_rows, B*D]   pe_ref: [tile_rows, D]   (VMEM tiles)
    ts, bd = x_ref.shape
    pe_rows = pe_ref[...]                                                 # [ts, D]

    do_dropout = training and p > 0.0
    if do_dropout:
        # Integer-threshold inverted dropout: keep iff bits >= round(p * 2^32).
        thresh = jnp.uint32(min(int(round(p * (1 << 32))), (1 << 32) - 1))
        scale = 1.0 / (1.0 - p)
        if use_hw_prng:
            # Re-seed per grid step so steps stay independent ("parallel" axis).
            pltpu.prng_seed(seed_ref[0] + pl.program_id(0))
        else:
            seed_u = seed_ref[0].astype(jnp.uint32)
            row0_u = (pl.program_id(0) * ts).astype(jnp.uint32)

    # One D-wide, lane-aligned strip per batch element: broadcasts pe over batch
    # without materializing a [tile_rows, B*D] temporary.
    for b in range(batch):
        lo = b * d_model
        y = x_ref[:, lo:lo + d_model] + pe_rows
        if do_dropout:
            if use_hw_prng:
                bits = pltpu.bitcast(pltpu.prng_random_bits((ts, d_model)), jnp.uint32)
            else:
                offset = row0_u * jnp.uint32(bd) + jnp.uint32(lo)
                bits = _hash_uniform_bits(seed_u, offset, bd, ts, d_model)
            keep = (bits >= thresh).astype(y.dtype)
            y = y * (keep * scale)
            # TODO(synk): PyTorch's dropout RNG stream cannot be bit-matched; only
            # the inverted-dropout distribution with keep-prob (1 - p) is reproduced.
        o_ref[:, lo:lo + d_model] = y.astype(o_ref.dtype)


def _pick_tile_bytes() -> int:
    """Per-generation x-tile size target: smaller on small-VMEM parts (v7x)."""
    try:
        vmem = pltpu.get_tpu_info().vmem_capacity_bytes
    except Exception:
        vmem = 64 << 20                                   # conservative default
    return (4 << 20) if vmem <= (64 << 20) else (8 << 20)


def positional_encoding_forward(x, pe_table, *, p=0.1, training=True, seed=0,
                                target_tile_bytes=None, max_tile_rows=2048,
                                use_hw_prng=True):
    """x: [S, B, D]; returns dropout(x + pe[:S]) with the same shape/dtype."""
    S, B, D = x.shape
    assert pe_table.shape[0] >= S and pe_table.shape[1] == D
    assert D % 128 == 0, "d_model must be a multiple of 128 for lane-aligned slices"
    BD = B * D
    x2 = x.reshape(S, BD)                                 # free, contiguous reshape
    pe = pe_table[:S].astype(x.dtype)                     # stream pe in the input dtype

    if target_tile_bytes is None:
        target_tile_bytes = _pick_tile_bytes()

    # Large, sublane-aligned row tiles (amortize ~0.35us/step).  Partial tail tiles
    # are handled by Pallas since pe is streamed, not dynamically sliced.
    row_bytes = BD * x.dtype.itemsize
    tile_rows = max(8, min(max_tile_rows, target_tile_bytes // max(row_bytes, 1)))
    tile_rows -= tile_rows % 8
    tile_rows = max(tile_rows, 8)
    if tile_rows >= S:
        # Keep >= 2 grid steps when S allows so both v7x TensorCores get work.
        tile_rows = ((S + 15) // 16) * 8 if S >= 16 else S
    n_blocks = pl.cdiv(S, tile_rows)

    # VMEM budget from the actual double-buffered x-in / out / pe footprint plus
    # headroom; stays <= 48 MiB so it is safe on v7x (64 MiB) and v5e/v6e (128 MiB).
    per_step_bytes = tile_rows * (2 * BD + D) * x.dtype.itemsize
    vmem_limit = int(min(48 << 20, max(32 << 20, 2 * per_step_bytes + (8 << 20))))

    kernel = functools.partial(_pe_dropout_kernel, p=float(p), training=bool(training),
                               batch=B, d_model=D, use_hw_prng=bool(use_hw_prng))

    out2 = pl.pallas_call(
        kernel,
        out_shape=jax.ShapeDtypeStruct((S, BD), x.dtype),
        grid_spec=pltpu.PrefetchScalarGridSpec(
            num_scalar_prefetch=1,                                          # seed -> SMEM
            grid=(n_blocks,),
            in_specs=[
                pl.BlockSpec((tile_rows, BD), lambda i, seed_ref: (i, 0)),  # x tile
                pl.BlockSpec((tile_rows, D), lambda i, seed_ref: (i, 0)),   # streamed pe
            ],
            out_specs=pl.BlockSpec((tile_rows, BD), lambda i, seed_ref: (i, 0)),
        ),
        compiler_params=pltpu.CompilerParams(
            dimension_semantics=("parallel",),   # per-step re-seeded RNG -> independent
            vmem_limit_bytes=vmem_limit,
        ),
    )(jnp.asarray([seed], dtype=jnp.int32), x2, pe)

    return out2.reshape(S, B, D)


if __name__ == "__main__":
    d_model = 512
    max_len = 64
    seq_len = 8
    batch = 2
    p = 0.1

    key = jax.random.PRNGKey(0)
    x = jax.random.normal(key, (seq_len, batch, d_model), dtype=jnp.float32)
    pe_table = _make_pe_table(max_len, d_model)

    ref = x + pe_table[:seq_len][:, None, :]

    # Eval mode: pure add must match the reference exactly.
    out_eval = positional_encoding_forward(x, pe_table, p=p, training=False)
    jax.block_until_ready(out_eval)
    assert out_eval.shape == (seq_len, batch, d_model)
    assert jnp.allclose(out_eval, ref, atol=1e-6), "PE add mismatch (eval mode)"

    # Training mode: inverted dropout with keep-prob 1-p using the hardware PRNG;
    # fall back to the stateless hash only if the HW PRNG cannot lower here.
    try:
        out_train = positional_encoding_forward(x, pe_table, p=p, training=True, seed=0)
        out_train = jax.block_until_ready(out_train)
    except Exception:
        out_train = positional_encoding_forward(x, pe_table, p=p, training=True, seed=0,
                                                use_hw_prng=False)
        out_train = jax.block_until_ready(out_train)

    assert out_train.shape == (seq_len, batch, d_model)
    assert out_train.dtype == jnp.float32

    # Structure check: every element is either 0 (dropped) or ref / (1 - p) (kept).
    scale = 1.0 / (1.0 - p)
    dropped = out_train == 0.0
    kept_ok = jnp.isclose(out_train, ref * scale, rtol=1e-5, atol=1e-5)
    assert bool(jnp.all(dropped | kept_ok)), "dropout output structure mismatch"
    drop_frac = float(jnp.mean(dropped.astype(jnp.float32)))
    assert 0.02 < drop_frac < 0.25, f"drop fraction {drop_frac} far from p={p}"

    print("KERNEL_OK")
</pallas_src>

<mosaic_0001>
module attributes {stable_mosaic.version = 11 : i64} {
  func.func @_pe_dropout_kernel(%arg0: i32, %arg1: memref<1xi32, #tpu.memory_space<smem>>, %arg2: memref<8x1024xf32, #tpu.memory_space<vmem>>, %arg3: memref<8x512xf32, #tpu.memory_space<vmem>>, %arg4: memref<8x1024xf32, #tpu.memory_space<vmem>>) attributes {dimension_semantics = [#tpu.dimension_semantics<parallel>], iteration_bounds = array<i64: 1>, scalar_prefetch = 1 : i64, scratch_operands = 0 : i64, tpu.core_type = #tpu.core_type<tc>, window_params = [{transform_indices = @transform_0, window_bounds = array<i64: 8, 1024>}, {transform_indices = @transform_1, window_bounds = array<i64: 8, 512>}, {transform_indices = @transform_2, window_bounds = array<i64: 8, 1024>}]} {
    %c0 = arith.constant 0 : index
    %c0_0 = arith.constant 0 : index
    %0 = vector.load %arg3[%c0, %c0_0] : memref<8x512xf32, #tpu.memory_space<vmem>>, vector<8x512xf32>
    %c0_1 = arith.constant 0 : index
    %c0_2 = arith.constant 0 : index
    %1 = vector.load %arg2[%c0_1, %c0_2] : memref<8x1024xf32, #tpu.memory_space<vmem>>, vector<8x512xf32>
    %2 = arith.addf %1, %0 : vector<8x512xf32>
    %c0_3 = arith.constant 0 : index
    %c0_4 = arith.constant 0 : index
    %3 = vector.load %arg4[%c0_3, %c0_4] : memref<8x1024xf32, #tpu.memory_space<vmem>>, vector<8x512xf32>
    tpu.vector_store %arg4[%c0_3, %c0_4], %2 {strides = array<i32>} : memref<8x1024xf32, #tpu.memory_space<vmem>>, vector<8x512xf32>,
    %c0_5 = arith.constant 0 : index
    %c512 = arith.constant 512 : index
    %4 = vector.load %arg2[%c0_5, %c512] : memref<8x1024xf32, #tpu.memory_space<vmem>>, vector<8x512xf32>
    %5 = arith.addf %4, %0 : vector<8x512xf32>
    %c0_6 = arith.constant 0 : index
    %c512_7 = arith.constant 512 : index
    %6 = vector.load %arg4[%c0_6, %c512_7] : memref<8x1024xf32, #tpu.memory_space<vmem>>, vector<8x512xf32>
    tpu.vector_store %arg4[%c0_6, %c512_7], %5 {strides = array<i32>} : memref<8x1024xf32, #tpu.memory_space<vmem>>, vector<8x512xf32>,
    return
  }
  func.func @transform_0(%arg0: i32, %arg1: memref<1xi32, #tpu.memory_space<smem>>) -> (i32, i32) {
    %c0_i32 = arith.constant 0 : i32
    %c0_i32_0 = arith.constant 0 : i32
    return %arg0, %c0_i32 : i32, i32
  }
  func.func @transform_1(%arg0: i32, %arg1: memref<1xi32, #tpu.memory_space<smem>>) -> (i32, i32) {
    %c0_i32 = arith.constant 0 : i32
    %c0_i32_0 = arith.constant 0 : i32
    return %arg0, %c0_i32 : i32, i32
  }
  func.func @transform_2(%arg0: i32, %arg1: memref<1xi32, #tpu.memory_space<smem>>) -> (i32, i32) {
    %c0_i32 = arith.constant 0 : i32
    %c0_i32_0 = arith.constant 0 : i32
    return %arg0, %c0_i32 : i32, i32
  }
}

</mosaic_0001>

<bundles_post_ra>
// kernel: tpu_custom_call.1
= control target key start
LH: loop header
LB: loop body
LE: loop exit
PB: predicated region body
PF: predicated region fallthrough
CT: control target
= control target key end

     0   :  { %9 = vsyncpa [#allocation5], 0  ;;  %s216_s0 = inlined_call_operand.<no memory space> [shape: s32[1], index: 0, kind: input, shape index: {}]   ;;  %s217_s1 = inlined_call_operand.hbm [shape: f32[8,1024], index: 1, kind: input, shape index: {}]   ;;  %s218_s2 = inlined_call_operand.hbm [shape: f32[8,512], index: 2, kind: input, shape index: {}]   ;;  %s219_s3 = inlined_call_operand.hbm [shape: f32[8,1024], index: 3, kind: output, shape index: {}]  }
   0x1   :  { %10 = vsyncpa [#allocation8], 0 }
   0x2   :  { %11 = vsyncpa [#allocation6], 0  ;;  %s157_s12 = smov [#allocation4]   ;;  %s158_s14 = smov [#allocation7]  }
   0x3   :  { %s18_s13 = sshll.u32 %s157_s12, 4  ;;  %s28_s15 = sshll.u32 %s158_s14, 4  ;;  %s19_s13 = int_to_ptr.vmem [resolvable:$true] %s18_s13  ;;  %s29_s15 = int_to_ptr.vmem [resolvable:$true] %s28_s15 }
   0x4   :  { %s85_s17 = scalar_lea.hbm %s217_s1, 1024 }
   0x5   :  { %p86_p0 = scmp.ne.s32.totalorder %s217_s1, %s85_s17  ;;  %p89_p1 = scmp.lt.u32.totalorder %s85_s17, %s217_s1 }
   0x7   :  { %p91_p2 = pnand %p89_p1, %p86_p0 }
   0x9   :  { %94 = shalt.err (!%p91_p2)
}
   0xa   :  { %s95_s22 = scalar_lea.vmem %s19_s13, 1024  ;;  %p100_p4 = scmp.lt.s32.totalorder %s19_s13, %s19_s13 }
   0xb   :  { %p96_p3 = scmp.ne.s32.totalorder %s19_s13, %s95_s22  ;;  %p101_p5 = scmp.lt.s32.totalorder %s95_s22, %s95_s22 }
   0xd   :  { %p102_p6 = por %p101_p5, %p100_p4 }
   0xf   :  { %p103_p7 = pnand %p102_p6, %p96_p3 }
  0x11   :  { %106 = shalt.err (!%p103_p7)
}
  0x12   :  { %21 = dma.hbm_to_vmem [thread:$0]  %s217_s1, 1024, %s19_s13, [#allocation5]  }
  0x13   :  { %s107_s27 = scalar_lea.hbm %s218_s2, 512 }
  0x14   :  { %p108_p8 = scmp.ne.s32.totalorder %s218_s2, %s107_s27  ;;  %p111_p9 = scmp.lt.u32.totalorder %s107_s27, %s218_s2 }
  0x16   :  { %p113_p10 = pnand %p111_p9, %p108_p8 }
  0x18   :  { %116 = shalt.err (!%p113_p10)
}
  0x19   :  { %s117_s5 = scalar_lea.vmem %s29_s15, 512  ;;  %p122_p12 = scmp.lt.s32.totalorder %s29_s15, %s29_s15 }
  0x1a   :  { %p118_p11 = scmp.ne.s32.totalorder %s29_s15, %s117_s5  ;;  %p123_p13 = scmp.lt.s32.totalorder %s117_s5, %s117_s5 }
  0x1c   :  { %p124_p0 = por %p123_p13, %p122_p12 }
  0x1e   :  { %p125_p1 = pnand %p124_p0, %p118_p11 }
  0x20   :  { %128 = shalt.err (!%p125_p1)
}
  0x21   :  { %31 = dma.hbm_to_vmem [thread:$0]  %s218_s2, 512, %s29_s15, [#allocation8]  }
  0x22   :  { %151 = dma.done.wait [#allocation5], 1024  }
  0x23   :  { %152 = vsyncadd [#allocation5], 4294966272 }
  0x24   :  { %153 = dma.done.wait [#allocation8], 512  }
  0x25   :  { %154 = vsyncadd [#allocation8], 4294966784  ;;  %v38_v0 = vld [vmem:[#allocation7] sm:$0xff]  ;;  %v39_v2 = vld [vmem:[#allocation7 + $0x8] sm:$0xff]  ;;  %s159_s7 = smov [#allocation9]  }
  0x26   :  { %v42_v1 = vld [vmem:[#allocation4] sm:$0xff]  ;;  %v43_v4 = vld [vmem:[#allocation4 + $0x8] sm:$0xff]  ;;  %v40_v5 = vld [vmem:[#allocation7 + $0x10] sm:$0xff]  ;;  %s72_s8 = sshll.u32 %s159_s7, 4  ;;  %s73_s8 = int_to_ptr.vmem [resolvable:$true] %s72_s8 }
  0x27   :  { %v46_v3 = vadd.f32 %v42_v1, %v38_v0  ;;  %v44_v6 = vld [vmem:[#allocation4 + $0x10] sm:$0xff]  ;;  %v47_v7 = vadd.f32 %v43_v4, %v39_v2  ;;  %v41_v9 = vld [vmem:[#allocation7 + $0x18] sm:$0xff]  ;;  %v54_v11 = vld [vmem:[#allocation4 + $0x20] sm:$0xff]  ;;  %s129_s2 = scalar_lea.vmem %s73_s8, 1024  ;;  %p134_p3 = scmp.lt.s32.totalorder %s73_s8, %s73_s8 }
  0x28   :  { %v48_v8 = vadd.f32 %v44_v6, %v40_v5  ;;  %v45_v10 = vld [vmem:[#allocation4 + $0x18] sm:$0xff]  ;;  %v58_v13 = vadd.f32 %v54_v11, %v38_v0  ;;  %v55_v14 = vld [vmem:[#allocation4 + $0x28] sm:$0xff]  ;;  %v56_v15 = vld [vmem:[#allocation4 + $0x30] sm:$0xff]  ;;  %p130_p2 = scmp.ne.s32.totalorder %s73_s8, %s129_s2  ;;  %p135_p4 = scmp.lt.s32.totalorder %s129_s2, %s129_s2 }
  0x29   :  { %50 = vst [vmem:[#allocation9] sm:$0xff] %v46_v3  ;;  %v49_v12 = vadd.f32 %v45_v10, %v41_v9  ;;  %v57_v16 = vld [vmem:[#allocation4 + $0x38] sm:$0xff]  ;;  %51 = vst [vmem:[#allocation9 + $0x8] sm:$0xff] %v47_v7  ;;  %v59_v17 = vadd.f32 %v55_v14, %v39_v2  ;;  %v60_v18 = vadd.f32 %v56_v15, %v40_v5 }
  0x2a   :  { %52 = vst [vmem:[#allocation9 + $0x10] sm:$0xff] %v48_v8  ;;  %v61_v19 = vadd.f32 %v57_v16, %v41_v9  ;;  %62 = vst [vmem:[#allocation9 + $0x20] sm:$0xff] %v58_v13  ;;  %p136_p5 = por %p135_p4, %p134_p3 }
  0x2b   :  { %53 = vst [vmem:[#allocation9 + $0x18] sm:$0xff] %v49_v12  ;;  %63 = vst [vmem:[#allocation9 + $0x28] sm:$0xff] %v59_v17 }
  0x2c   :  { %64 = vst [vmem:[#allocation9 + $0x30] sm:$0xff] %v60_v18  ;;  %65 = vst [vmem:[#allocation9 + $0x38] sm:$0xff] %v61_v19  ;;  %p137_p6 = pnand %p136_p5, %p130_p2 }
  0x2e   :  { %140 = shalt.err (!%p137_p6)
}
  0x2f   :  { %s141_s11 = scalar_lea.hbm %s219_s3, 1024 }
  0x30   :  { %p142_p7 = scmp.ne.s32.totalorder %s219_s3, %s141_s11  ;;  %p145_p8 = scmp.lt.u32.totalorder %s141_s11, %s219_s3 }
  0x32   :  { %p147_p9 = pnand %p145_p8, %p142_p7 }
  0x34   :  { %150 = shalt.err (!%p147_p9)
}
  0x35   :  { %75 = dma.vmem_to_hbm [thread:$0]  %s73_s8, 1024, %s219_s3, [#allocation6]  }
  0x36   :  { %155 = dma.done.wait [#allocation6], 1024  }
  0x37   :  { %156 = vsyncadd [#allocation6], 4294966272 }
  0x38   :  { %79 = vsyncpa [#allocation5], 1 }
  0x39   :  { %80 = vsyncpa [#allocation8], 1 }
  0x3a   :  { %81 = vsyncpa [#allocation6], 1 }

</bundles_post_ra>
